<compile_context>
chip_gen: v6e
topology: v6e:2x2x1
jax: 0.10.0
libtpu: 0.0.40
codegen_flags: <defaults>
</compile_context>

<pallas_src>
import jax
import jax.numpy as jnp
from jax import lax
from jax.experimental import pallas as pl
from jax.experimental.pallas import tpu as pltpu

BN_EPS = 1e-5
LEAKY_SLOPE = 0.01


def _decoder_block_kernel(x_ref, w1_ref, p_ref, w2_ref, o_ref):
    """One decoder forward on a (B, E) block. Shared by the single-call and gridded paths."""
    H = w1_ref.shape[1]
    out_dim = o_ref.shape[1]

    # ---- Linear 1 (bias omitted: exactly cancelled by the BN mean subtraction) ----
    # No pre-cast: MXU runs in the storage dtype (f32 or bf16) and accumulates in f32.
    h = jnp.dot(x_ref[...], w1_ref[...], preferred_element_type=jnp.float32)

    # ---- BatchNorm1d over the batch rows of this block (training-mode stats), fused affine ----
    mean = jnp.mean(h, axis=0, keepdims=True)
    hc = h - mean
    var = jnp.mean(hc * hc, axis=0, keepdims=True)      # biased var, as PyTorch normalizes
    gamma = p_ref[0:1, 0:H].astype(jnp.float32)
    beta = p_ref[1:2, 0:H].astype(jnp.float32)
    scale = gamma * lax.rsqrt(var + BN_EPS)
    h = hc * scale + beta

    # ---- LeakyReLU(0.01): single vmax (valid because 0 < slope < 1) ----
    h = jnp.maximum(h, LEAKY_SLOPE * h)

    # ---- Linear 2 (zero-initialized per last_linear_layer_init_zero=True) ----
    b2 = p_ref[2:3, 0:out_dim].astype(jnp.float32)
    out = jnp.dot(h, w2_ref[...], preferred_element_type=jnp.float32) + b2

    o_ref[...] = out.astype(o_ref.dtype)


def prepare_params(params):
    """One-time parameter prep (hoisted out of the forward path).

    Packs the tiny per-channel vectors (gamma, beta, b2) into a single (3, P) buffer so the
    kernel takes 4 inputs instead of 6 (fewer fixed-cost DMAs). Call once, reuse every step.
    """
    gamma, beta, b2 = params["gamma"], params["beta"], params["b2"]
    H = gamma.shape[1]
    out_dim = b2.shape[1]
    pw = max(H, out_dim)

    def _pad(v):
        return jnp.pad(v, ((0, 0), (0, pw - v.shape[1])))

    packed = jnp.concatenate([_pad(gamma), _pad(beta), _pad(b2)], axis=0)  # (3, pw)
    return {"w1": params["w1"], "packed": packed, "w2": params["w2"]}


def vector_decoder_forward(x, prepped):
    """Single module call: x (B, embedding_dim) -> (B, output_shape). One VMEM block, no grid."""
    B, E = x.shape
    w1, packed, w2 = prepped["w1"], prepped["packed"], prepped["w2"]
    H = w1.shape[1]
    out_dim = w2.shape[1]

    vmem = pl.BlockSpec(memory_space=pltpu.MemorySpace.VMEM)
    bytes_accessed = (
        x.size * x.dtype.itemsize
        + w1.size * w1.dtype.itemsize
        + packed.size * packed.dtype.itemsize
        + w2.size * w2.dtype.itemsize
        + B * out_dim * x.dtype.itemsize
    )
    cost = pl.CostEstimate(
        flops=2 * B * (E * H + H * out_dim),
        transcendentals=H,
        bytes_accessed=bytes_accessed,
    )

    return pl.pallas_call(
        _decoder_block_kernel,
        out_shape=jax.ShapeDtypeStruct((B, out_dim), x.dtype),
        in_specs=[vmem] * 4,
        out_specs=vmem,
        cost_estimate=cost,
    )(x, w1, packed, w2)


def vector_decoder_forward_steps(xs, prepped):
    """Batched path: T independent decoder calls fused into ONE gridded pallas_call.

    xs: (T, B, embedding_dim) -> (T, B, output_shape). Weights stay resident in VMEM across
    the T grid steps; each step computes BatchNorm statistics over its own B rows, so the
    result is bit-for-bit the semantics of T separate module calls.
    """
    T, B, E = xs.shape
    w1, packed, w2 = prepped["w1"], prepped["packed"], prepped["w2"]
    H = w1.shape[1]
    out_dim = w2.shape[1]

    # Contiguous (free) reshape to a lane-/sublane-dense 2D slab; one output array write.
    x_flat = xs.reshape(T * B, E)

    itemsize = x_flat.dtype.itemsize
    cost = pl.CostEstimate(
        flops=2 * T * B * (E * H + H * out_dim),
        transcendentals=T * H,
        bytes_accessed=(
            x_flat.size * itemsize
            + w1.size * w1.dtype.itemsize
            + packed.size * packed.dtype.itemsize
            + w2.size * w2.dtype.itemsize
            + T * B * out_dim * itemsize
        ),
    )

    out_flat = pl.pallas_call(
        _decoder_block_kernel,
        out_shape=jax.ShapeDtypeStruct((T * B, out_dim), xs.dtype),
        grid_spec=pltpu.PrefetchScalarGridSpec(
            num_scalar_prefetch=0,
            grid=(T,),
            in_specs=[
                pl.BlockSpec((B, E), lambda t: (t, 0)),          # per-step activations
                pl.BlockSpec((E, H), lambda t: (0, 0)),          # w1: resident in VMEM
                pl.BlockSpec(packed.shape, lambda t: (0, 0)),    # gamma/beta/b2 pack: resident
                pl.BlockSpec((H, out_dim), lambda t: (0, 0)),    # w2: resident in VMEM
            ],
            out_specs=pl.BlockSpec((B, out_dim), lambda t: (t, 0)),
        ),
        compiler_params=pltpu.CompilerParams(
            # Steps are fully independent -> shard across v7x's two TensorCores.
            dimension_semantics=("parallel",),
        ),
        cost_estimate=cost,
    )(x_flat, w1, packed, w2)
    return out_flat.reshape(T, B, out_dim)


def init_params(key, embedding_dim, hidden_channels, output_shape,
                dtype=jnp.float32, last_linear_layer_init_zero=True):
    """Deterministic parameter init mimicking the module's shapes."""
    k1, k2, k3, k4 = jax.random.split(key, 4)
    bound1 = 1.0 / jnp.sqrt(embedding_dim)
    w1 = jax.random.uniform(k1, (embedding_dim, hidden_channels), dtype, -bound1, bound1)
    b1 = jax.random.uniform(k2, (1, hidden_channels), dtype, -bound1, bound1)
    gamma = jnp.ones((1, hidden_channels), dtype)   # BN weight
    beta = jnp.zeros((1, hidden_channels), dtype)   # BN bias
    if last_linear_layer_init_zero:
        w2 = jnp.zeros((hidden_channels, output_shape), dtype)
        b2 = jnp.zeros((1, output_shape), dtype)
    else:
        bound2 = 1.0 / jnp.sqrt(hidden_channels)
        w2 = jax.random.uniform(k3, (hidden_channels, output_shape), dtype, -bound2, bound2)
        b2 = jax.random.uniform(k4, (1, output_shape), dtype, -bound2, bound2)
    return {"w1": w1, "b1": b1, "gamma": gamma, "beta": beta, "w2": w2, "b2": b2}


def reference_forward(x, params):
    """Pure-JAX reference of the PyTorch forward (keeps b1 to validate its BN cancellation)."""
    h = x @ params["w1"] + params["b1"]
    mean = jnp.mean(h, axis=0, keepdims=True)
    var = jnp.mean((h - mean) ** 2, axis=0, keepdims=True)
    h = (h - mean) / jnp.sqrt(var + BN_EPS)
    h = h * params["gamma"] + params["beta"]
    h = jnp.where(h > 0, h, LEAKY_SLOPE * h)
    return h @ params["w2"] + params["b2"]


if __name__ == "__main__":
    # Small shapes consistent with the module's forward: x is (B, embedding_dim).
    B = 8
    embedding_dim = 32
    hidden_channels = 64
    output_shape = 16       # length of the decoded vector observation
    T = 16                  # number of per-timestep decoder calls for the batched path

    key = jax.random.PRNGKey(0)
    kx, kxs, kp1, kp2 = jax.random.split(key, 4)

    # --- single-call path (module-default zero-initialized last layer) ---
    params_zero = init_params(kp1, embedding_dim, hidden_channels, output_shape,
                              last_linear_layer_init_zero=True)
    prepped_zero = prepare_params(params_zero)      # one-time prep, outside the hot path
    x = jax.random.normal(kx, (B, embedding_dim), jnp.float32)
    out = jax.block_until_ready(vector_decoder_forward(x, prepped_zero))
    ref = reference_forward(x, params_zero)
    assert out.shape == (B, output_shape), out.shape
    assert jnp.allclose(out, ref, atol=1e-5, rtol=1e-5), "single-call kernel mismatch"

    # --- batched timestep path (non-zero last layer so the full math is exercised) ---
    params_nz = init_params(kp2, embedding_dim, hidden_channels, output_shape,
                            last_linear_layer_init_zero=False)
    prepped_nz = prepare_params(params_nz)
    xs = jax.random.normal(kxs, (T, B, embedding_dim), jnp.float32)
    outs = jax.block_until_ready(vector_decoder_forward_steps(xs, prepped_nz))
    refs = jax.vmap(lambda xt: reference_forward(xt, params_nz))(xs)
    assert outs.shape == (T, B, output_shape), outs.shape
    assert jnp.allclose(outs, refs, atol=1e-5, rtol=1e-5), "batched kernel mismatch"

    print("KERNEL_OK")
</pallas_src>

<mosaic_0001>
module attributes {stable_mosaic.version = 11 : i64} {
  func.func @_decoder_block_kernel(%arg0: memref<8x32xf32, #tpu.memory_space<vmem>>, %arg1: memref<32x64xf32, #tpu.memory_space<vmem>>, %arg2: memref<3x64xf32, #tpu.memory_space<vmem>>, %arg3: memref<64x16xf32, #tpu.memory_space<vmem>>, %arg4: memref<8x16xf32, #tpu.memory_space<vmem>>) attributes {dimension_semantics = [], scalar_prefetch = 0 : i64, scratch_operands = 0 : i64, tpu.core_type = #tpu.core_type<tc>} {
    %c0 = arith.constant 0 : index
    %c0_0 = arith.constant 0 : index
    %0 = vector.load %arg0[%c0, %c0_0] : memref<8x32xf32, #tpu.memory_space<vmem>>, vector<8x32xf32>
    %c0_1 = arith.constant 0 : index
    %c0_2 = arith.constant 0 : index
    %1 = vector.load %arg1[%c0_1, %c0_2] : memref<32x64xf32, #tpu.memory_space<vmem>>, vector<32x64xf32>
    %cst = arith.constant dense<0.000000e+00> : vector<8x64xf32>
    %2 = tpu.matmul %0, %1, %cst {dimension_numbers = #tpu.dot_dimension_numbers<[1], [0], [0], [1], [0, 0, 1, 1], [], []>} : vector<8x32xf32>, vector<32x64xf32>, vector<8x64xf32> -> vector<8x64xf32>
    %cst_3 = arith.constant dense<0.000000e+00> : vector<64xf32>
    %3 = vector.multi_reduction <add>, %2, %cst_3 [0] : vector<8x64xf32> to vector<64xf32>
    %4 = vector.shape_cast %3 : vector<64xf32> to vector<1x64xf32>
    %cst_4 = arith.constant 8.000000e+00 : f32
    %5 = vector.broadcast %cst_4 : f32 to vector<1x64xf32>
    %6 = arith.divf %4, %5 : vector<1x64xf32>
    %7 = vector.broadcast %6 : vector<1x64xf32> to vector<8x64xf32>
    %8 = arith.subf %2, %7 : vector<8x64xf32>
    %9 = arith.mulf %8, %8 : vector<8x64xf32>
    %cst_5 = arith.constant dense<0.000000e+00> : vector<64xf32>
    %10 = vector.multi_reduction <add>, %9, %cst_5 [0] : vector<8x64xf32> to vector<64xf32>
    %11 = vector.shape_cast %10 : vector<64xf32> to vector<1x64xf32>
    %cst_6 = arith.constant 8.000000e+00 : f32
    %12 = vector.broadcast %cst_6 : f32 to vector<1x64xf32>
    %13 = arith.divf %11, %12 : vector<1x64xf32>
    %c0_7 = arith.constant 0 : index
    %c0_8 = arith.constant 0 : index
    %14 = vector.load %arg2[%c0_7, %c0_8] : memref<3x64xf32, #tpu.memory_space<vmem>>, vector<1x64xf32>
    %c1 = arith.constant 1 : index
    %c0_9 = arith.constant 0 : index
    %15 = vector.load %arg2[%c1, %c0_9] : memref<3x64xf32, #tpu.memory_space<vmem>>, vector<1x64xf32>
    %cst_10 = arith.constant 9.99999974E-6 : f32
    %16 = vector.broadcast %cst_10 : f32 to vector<1x64xf32>
    %17 = arith.addf %13, %16 : vector<1x64xf32>
    %18 = math.rsqrt %17 : vector<1x64xf32>
    %19 = arith.mulf %14, %18 : vector<1x64xf32>
    %20 = vector.broadcast %19 : vector<1x64xf32> to vector<8x64xf32>
    %21 = arith.mulf %8, %20 : vector<8x64xf32>
    %22 = vector.broadcast %15 : vector<1x64xf32> to vector<8x64xf32>
    %23 = arith.addf %21, %22 : vector<8x64xf32>
    %cst_11 = arith.constant 0.00999999977 : f32
    %24 = vector.broadcast %cst_11 : f32 to vector<8x64xf32>
    %25 = arith.mulf %24, %23 : vector<8x64xf32>
    %26 = arith.maximumf %23, %25 : vector<8x64xf32>
    %c2 = arith.constant 2 : index
    %c0_12 = arith.constant 0 : index
    %27 = vector.load %arg2[%c2, %c0_12] : memref<3x64xf32, #tpu.memory_space<vmem>>, vector<1x16xf32>
    %c0_13 = arith.constant 0 : index
    %c0_14 = arith.constant 0 : index
    %28 = vector.load %arg3[%c0_13, %c0_14] : memref<64x16xf32, #tpu.memory_space<vmem>>, vector<64x16xf32>
    %cst_15 = arith.constant dense<0.000000e+00> : vector<8x16xf32>
    %29 = tpu.matmul %26, %28, %cst_15 {dimension_numbers = #tpu.dot_dimension_numbers<[1], [0], [0], [1], [0, 0, 1, 1], [], []>} : vector<8x64xf32>, vector<64x16xf32>, vector<8x16xf32> -> vector<8x16xf32>
    %30 = vector.broadcast %27 : vector<1x16xf32> to vector<8x16xf32>
    %31 = arith.addf %29, %30 : vector<8x16xf32>
    %c0_16 = arith.constant 0 : index
    %c0_17 = arith.constant 0 : index
    %32 = vector.load %arg4[%c0_16, %c0_17] : memref<8x16xf32, #tpu.memory_space<vmem>>, vector<8x16xf32>
    tpu.vector_store %arg4[%c0_16, %c0_17], %31 {strides = array<i32>} : memref<8x16xf32, #tpu.memory_space<vmem>>, vector<8x16xf32>,
    return
  }
}

</mosaic_0001>

<bundles_post_ra>
// kernel: tpu_custom_call.1
= control target key start
LH: loop header
LB: loop body
LE: loop exit
PB: predicated region body
PF: predicated region fallthrough
CT: control target
= control target key end

     0   :  { %v311_v1 = vmov 0.0   ;;  %vm312_vm0 = vmmov 0   ;;  %s393_s0 = inlined_call_operand.vmem [shape: f32[8,32], index: 0, kind: input, shape index: {}]   ;;  %s394_s1 = inlined_call_operand.vmem [shape: f32[32,64], index: 1, kind: input, shape index: {}]   ;;  %s395_s2 = inlined_call_operand.vmem [shape: f32[3,64], index: 2, kind: input, shape index: {}]   ;;  %s396_s3 = inlined_call_operand.vmem [shape: f32[64,16], index: 3, kind: input, shape index: {}]   ;;  %s397_s4 = inlined_call_operand.hbm [shape: f32[8,16], index: 4, kind: output, shape index: {}]  }
   0x1   :  { %v22_v0 = vld [vmem:[%s394_s1 + $0x18] sm:$0xff]  ;;  %254 = vmatprep.subr.mxu0 %v311_v1  ;;  %v21_v2 = vld [vmem:[%s394_s1 + $0x10] sm:$0xff]  ;;  %262 = vmatprep.mubr.msk.f32.mxu0 %vm312_vm0, %v311_v1 }
   0x2   :  { %9 = vsyncpa [#allocation3], 0  ;;  %255 = vmatpush3.msra.mxu0 %v22_v0  ;;  %265 = vmatprep.subr.mxu1 %v311_v1  ;;  %v20_v3 = vld [vmem:[%s394_s1 + $0x8] sm:$0xff]  ;;  %v19_v4 = vld [vmem:[%s394_s1] sm:$0xff]  ;;  %vm23_vm1 = vcmask 261120   ;;  %vm97_vm2 = vcmask 523264   ;;  %v122_v35 = vlaneseq }
   0x3   :  { %256 = vmatprep.subr.mxu0 %v311_v1  ;;  %281 = vmatprep.mubr.msk.f32.mxu1 %vm312_vm0, %v311_v1  ;;  %v18_v5 = vld [vmem:[%s393_s0] sm:$0xff]  ;;  %v142_v6 = vld [vmem:[%s396_s3 + $0x38] sm:$0xff]  ;;  %v141_v7 = vld [vmem:[%s396_s3 + $0x30] sm:$0xff]  ;;  %s313_s18 = smov [#allocation2]   ;;  %vm220_vm3 = vcmask 130048  }
   0x4   :  { %257 = vmatpush3.msra.mxu0 %v21_v2  ;;  %266 = vmatpush3.msra.mxu1 %v142_v6  ;;  %v140_v8 = vld [vmem:[%s396_s3 + $0x28] sm:$0xff]  ;;  %v139_v9 = vld [vmem:[%s396_s3 + $0x20] sm:$0xff]  ;;  %v138_v10 = vld [vmem:[%s396_s3 + $0x18] sm:$0xff]  ;;  %v123_v36 = vshrl.u32 %v122_v35, 7  ;;  %s228_s19 = sshll.u32 %s313_s18, 4  ;;  %s229_s19 = int_to_ptr.vmem [resolvable:$true] %s228_s19 }
   0x5   :  { %258 = vmatprep.subr.mxu0 %v311_v1  ;;  %267 = vmatprep.subr.mxu1 %v311_v1  ;;  %v137_v11 = vld [vmem:[%s396_s3 + $0x10] sm:$0xff]  ;;  %v136_v12 = vld [vmem:[%s396_s3 + $0x8] sm:$0xff]  ;;  %v135_v13 = vld [vmem:[%s396_s3] sm:$0xff]  ;;  %s289_s20 = scalar_lea.vmem %s229_s19, 128  ;;  %p294_p1 = scmp.lt.s32.totalorder %s229_s19, %s229_s19 }
   0x6   :  { %259 = vmatpush3.msra.mxu0 %v20_v3  ;;  %268 = vmatpush3.msra.mxu1 %v141_v7  ;;  %v117_v37 = vld [vmem:[%s395_s2] sm:$0x1]  ;;  %v124_v38 = vsub.s32 0, %v123_v36  ;;  %v237_v42 = vld [vmem:[%s395_s2 + $0x1] ss:$0 sm:$0xff]  ;;  %p290_p0 = scmp.ne.s32.totalorder %s229_s19, %s289_s20  ;;  %p295_p2 = scmp.lt.s32.totalorder %s289_s20, %s289_s20 }
   0x7   :  { %260 = vmatprep.subr.mxu0 %v311_v1  ;;  %269 = vmatprep.subr.mxu1 %v311_v1  ;;  %v238_v47 = vld [vmem:[%s395_s2 + $0x2] ss:$0 sm:$0xff] }
   0x8   :  { %261 = vmatpush3.msra.mxu0 %v19_v4  ;;  %270 = vmatpush3.msra.mxu1 %v140_v8  ;;  %p296_p3 = por %p295_p2, %p294_p1 }
   0x9   :  { %263 = vmatmul.mubr.msk.f32.vlgmr.msra.gmra.mxu0 %vm23_vm1, %v18_v5  ;;  %271 = vmatprep.subr.mxu1 %v311_v1 }
   0xa   :  { %272 = vmatpush3.msra.mxu1 %v139_v9  ;;  %p297_p4 = pnand %p296_p3, %p290_p0 }
   0xb   :  { %273 = vmatprep.subr.mxu1 %v311_v1 }
   0xc   :  { %274 = vmatpush3.msra.mxu1 %v138_v10 }
   0xd   :  { %275 = vmatprep.subr.mxu1 %v311_v1 }
   0xe   :  { %276 = vmatpush3.msra.mxu1 %v137_v11 }
   0xf   :  { %277 = vmatprep.subr.mxu1 %v311_v1 }
  0x10   :  { %278 = vmatpush3.msra.mxu1 %v136_v12 }
  0x11   :  { %279 = vmatprep.subr.mxu1 %v311_v1 }
  0x12   :  { %280 = vmatpush3.msra.mxu1 %v135_v13 }
  0xc9   :  { %v93_v14 = vpop.f32.mrf.mxu0 }
  0xca   :  { %v98_v15 = vsel %vm97_vm2, %v93_v14, 0.0 }
  0xcb   :  { %v99_v16 = vrot.slane %v98_v15, 4  ;;  %v264_v17 = vpop.f32.mrf.mxu0 }
  0xcd   :  { %v100_v18 = vadd.f32 %v99_v16, %v98_v15 }
  0xcf   :  { %v101_v19 = vrot.slane %v100_v18, 2 }
  0xd1   :  { %v102_v20 = vadd.f32 %v101_v19, %v100_v18 }
  0xd3   :  { %v103_v21 = vrot.slane %v102_v20, 1 }
  0xd5   :  { %v104_v22 = vadd.f32 %v103_v21, %v102_v20 }
  0xd7   :  { %v106_v23 = vmul.f32 0.125, %v104_v22 }
  0xd9   :  { %v107_v24 = vsub.f32 %v93_v14, %v106_v23 }
  0xdb   :  { %v108_v25 = vmul.f32 %v107_v24, %v107_v24 }
  0xdd   :  { %v109_v26 = vsel %vm97_vm2, %v108_v25, 0.0 }
  0xde   :  { %v110_v27 = vrot.slane %v109_v26, 4 }
  0xe0   :  { %v111_v28 = vadd.f32 %v110_v27, %v109_v26 }
  0xe2   :  { %v112_v29 = vrot.slane %v111_v28, 2 }
  0xe4   :  { %v113_v30 = vadd.f32 %v112_v29, %v111_v28 }
  0xe6   :  { %v114_v31 = vrot.slane %v113_v30, 1 }
  0xe8   :  { %v115_v32 = vadd.f32 %v114_v31, %v113_v30 }
  0xea   :  { %v116_v33 = vmul.f32 0.125, %v115_v32 }
  0xec   :  { %v119_v34 = vadd.f32 1e-05, %v116_v33 }
  0xee   :  { %287 = vrsqrt.f32 %v119_v34 }
  0xfb   :  { %v288_v39 = vpop.eup %287 }
  0xfc   :  { %v121_v40 = vmul.f32 %v288_v39, %v117_v37 }
  0xfe   :  { %v125_v41 = vrot.slane %v121_v40, %v124_v38 }
 0x100   :  { %v126_v43 = vmul.f32 %v125_v41, %v107_v24 }
 0x102   :  { %v131_v44 = vadd.f32 %v237_v42, %v126_v43 }
 0x104   :  { %v132_v45 = vmul.f32 0.01, %v131_v44 }
 0x106   :  { %v133_v46 = vmax.f32 %v131_v44, %v132_v45 }
 0x108   :  { %282 = vmatmul.mubr.msk.f32.vlgmr.msra.gmra.mxu1 %vm97_vm2, %v133_v46 }
 0x1c8   :  { %v216_v48 = vpop.f32.mrf.mxu1 }
 0x1c9   :  { %v217_v49 = vadd.f32 %v238_v47, %v216_v48 }
 0x1ca   :  { %v283_v50 = vpop.f32.mrf.mxu1 }
 0x1cb   :  { %221 = vst.msk [vmem:[#allocation2] sm:$0xff] %vm220_vm3, %v217_v49 }
 0x1cc   :  { %300 = shalt.err (!%p297_p4)
}
 0x1cd   :  { %231 = dma.vmem_to_hbm [thread:$0]  %s229_s19, 128, %s397_s4, [#allocation3]  }
 0x1ce   :  { %309 = dma.done.wait [#allocation3], 128  }
 0x1cf   :  { %310 = vsyncadd [#allocation3], 4294967168 }
 0x1d0   :  { %235 = vsyncpa [#allocation3], 1 }

</bundles_post_ra>
